<compile_context>
chip_gen: v6e
topology: v6e:2x2x1
jax: 0.10.0
libtpu: 0.0.40
codegen_flags: <defaults>
</compile_context>

<pallas_src>
import functools

import jax
import jax.numpy as jnp
from jax.experimental import pallas as pl
from jax.experimental.pallas import tpu as pltpu

_MIB = 1024 * 1024


def bert_output_kernel(x_ref, res_ref, w_ref, b_ref, gamma_ref, beta_ref, o_ref,
                       *, eps, inv_h, matmul_dtype):
    # Per-tile cast of the activations to the MXU operand dtype (bf16 by default).
    # Doing this inside the pipelined kernel avoids an extra HBM round trip.
    x = x_ref[...]
    if matmul_dtype is not None and x.dtype != jnp.dtype(matmul_dtype):
        x = x.astype(matmul_dtype)

    # Dense: [TM, I] @ [I, H] with f32 accumulation on the MXU.
    acc = jnp.dot(x, w_ref[...], preferred_element_type=jnp.float32)

    # Dropout: inference mode -> identity.
    # TODO(synk): training-mode dropout (pltpu.prng_random_bits mask) not implemented.

    # Fused bias + residual add, kept in f32 (v5e has no bf16 VPU/EUP).
    h = acc + (res_ref[...].astype(jnp.float32) + b_ref[...].astype(jnp.float32))

    # One-pass LayerNorm statistics (XLU reductions): var = E[h^2] - mean^2.
    s1 = jnp.sum(h, axis=-1, keepdims=True)
    s2 = jnp.sum(h * h, axis=-1, keepdims=True)
    mean = s1 * inv_h
    var = jnp.maximum(s2 * inv_h - mean * mean, 0.0)  # guard tiny cancellation negatives
    inv = jax.lax.rsqrt(var + eps)                    # EUP

    out = (h - mean) * (inv * gamma_ref[...].astype(jnp.float32)) \
          + beta_ref[...].astype(jnp.float32)
    o_ref[...] = out.astype(o_ref.dtype)


def _vmem_capacity_bytes():
    """Physical VMEM of the current chip; conservative 64 MiB (v7x per-TC) if unknown."""
    try:
        return int(pltpu.get_tpu_info().vmem_capacity_bytes)
    except Exception:
        return 64 * _MIB


def _pick_tm(T, tile_itemsize, vmem_cap):
    # Larger tiles on 128 MiB parts (v5e/v6e), conservative on 64 MiB (v7x).
    big_vmem = vmem_cap >= 96 * _MIB
    if tile_itemsize <= 2:
        cap = 1024 if big_vmem else 512
    else:
        cap = 512 if big_vmem else 256
    return min(T, cap)


def _vmem_need(tm, I, H, x_isz, w_isz, res_isz, out_isz, param_bufs):
    # Resident weight + LN/bias params (param_bufs buffers each), plus
    # double-buffered activation / residual / output tiles.
    params = 3 * 8 * max(H, 128) * 4  # (1, H) params pad to at least an (8, 128) word tile
    return (param_bufs * (I * H * w_isz + params)
            + 2 * tm * I * x_isz
            + 2 * tm * H * res_isz
            + 2 * tm * H * out_isz)


def bert_output(hidden_states, input_tensor, w, b, gamma, beta,
                *, eps=1e-12, matmul_dtype=jnp.bfloat16, tm=None):
    """BertOutput forward: LayerNorm(dropout(hidden_states @ w + b) + input_tensor).

    hidden_states: [T, I]   input_tensor: [T, H]   w: [I, H]   b/gamma/beta: [H]

    matmul_dtype: MXU operand dtype (default bf16).  Accumulation, the residual
    add and LayerNorm statistics are always f32.  Pass None for pure f32 MXU
    operands.  For best performance H should be a multiple of 128.
    """
    T, I = hidden_states.shape
    H = input_tensor.shape[-1]
    out_dtype = input_tensor.dtype

    # Only the (one-off, resident) weight is cast in the wrapper; the per-tile
    # activation cast happens inside the kernel so it is hidden by the pipeline.
    if matmul_dtype is not None and w.dtype != jnp.dtype(matmul_dtype):
        wm = w.astype(matmul_dtype)
    else:
        wm = w

    # Keep 1-D params as [1, H] so they map onto (sublane, lane) cleanly.
    b2, g2, be2 = b.reshape(1, H), gamma.reshape(1, H), beta.reshape(1, H)

    x_isz = jnp.dtype(hidden_states.dtype).itemsize   # dtype actually DMA'd / resident in VMEM
    w_isz = jnp.dtype(wm.dtype).itemsize
    res_isz = jnp.dtype(input_tensor.dtype).itemsize
    out_isz = jnp.dtype(out_dtype).itemsize

    vmem_cap = _vmem_capacity_bytes()
    budget = int(0.80 * vmem_cap)          # leave headroom below physical VMEM

    if tm is None:
        tm = _pick_tm(T, x_isz, vmem_cap)
    # Shrink TM until the resident-weight plan fits the budget (with margin),
    # instead of silently clamping the VMEM limit below what the plan needs.
    while tm > 8 and int(1.2 * _vmem_need(tm, I, H, x_isz, w_isz, res_isz, out_isz, 2)) > budget:
        tm = max(8, tm // 2)
    need = _vmem_need(tm, I, H, x_isz, w_isz, res_isz, out_isz, 2)
    if int(1.2 * need) > budget:
        # TODO(synk): K/H-tiled fallback for weights too large to stay resident in VMEM.
        raise ValueError(
            f"Resident-weight plan needs ~{need / _MIB:.1f} MiB VMEM, above the "
            f"{budget / _MIB:.1f} MiB budget for this chip; tile the weight instead.")
    vmem_limit = min(max(int(1.3 * need), 32 * _MIB), budget)

    grid = (pl.cdiv(T, tm),)

    cost = pl.CostEstimate(
        flops=2 * T * I * H,
        transcendentals=T,                 # one rsqrt per row
        bytes_accessed=(T * I * x_isz + I * H * w_isz
                        + T * H * res_isz + T * H * out_isz + 3 * H * 4),
    )

    kernel = functools.partial(
        bert_output_kernel, eps=eps, inv_h=1.0 / H, matmul_dtype=matmul_dtype)

    def call(single_buffer_params):
        resident_kwargs = (
            dict(pipeline_mode=pl.Buffered(1)) if single_buffer_params else {})
        in_specs = [
            pl.BlockSpec((tm, I), lambda i: (i, 0)),                     # activations (tiled T)
            pl.BlockSpec((tm, H), lambda i: (i, 0)),                     # residual    (tiled T)
            pl.BlockSpec((I, H), lambda i: (0, 0), **resident_kwargs),   # weight (resident)
            pl.BlockSpec((1, H), lambda i: (0, 0), **resident_kwargs),   # bias
            pl.BlockSpec((1, H), lambda i: (0, 0), **resident_kwargs),   # gamma
            pl.BlockSpec((1, H), lambda i: (0, 0), **resident_kwargs),   # beta
        ]
        return pl.pallas_call(
            kernel,
            out_shape=jax.ShapeDtypeStruct((T, H), out_dtype),
            grid=grid,
            in_specs=in_specs,
            out_specs=pl.BlockSpec((tm, H), lambda i: (i, 0)),
            compiler_params=pltpu.CompilerParams(
                dimension_semantics=("parallel",),   # independent token tiles (megacore / v7x)
                vmem_limit_bytes=vmem_limit,
            ),
            cost_estimate=cost,
        )(hidden_states, input_tensor, wm, b2, g2, be2)

    try:
        # Constant-index_map operands need only one buffer; halves the weight's
        # VMEM footprint (matters on v7x's 64 MiB VMEM).
        return call(single_buffer_params=True)
    except Exception:
        # Fallback to default double buffering if this Pallas build rejects Buffered(1).
        return call(single_buffer_params=False)


if __name__ == "__main__":
    # Small but lane-dense config: batch=2, seq=8, hidden_size=128, intermediate_size=512.
    B, S, H, I = 2, 8, 128, 512
    eps = 1e-12

    key = jax.random.PRNGKey(0)
    k1, k2, k3, k4 = jax.random.split(key, 4)

    hidden_states = jax.random.normal(k1, (B, S, I), dtype=jnp.float32)
    input_tensor = jax.random.normal(k2, (B, S, H), dtype=jnp.float32)

    # Deterministic synthetic parameters (nn.Linear / LayerNorm shapes).
    w = jax.random.normal(k3, (I, H), dtype=jnp.float32) * 0.02   # dense weight [in, out]
    b = jax.random.normal(k4, (H,), dtype=jnp.float32) * 0.02     # dense bias
    gamma = jnp.ones((H,), dtype=jnp.float32)                     # LayerNorm weight
    beta = jnp.zeros((H,), dtype=jnp.float32)                     # LayerNorm bias

    x2d = hidden_states.reshape(B * S, I)
    r2d = input_tensor.reshape(B * S, H)

    # Pure-JAX f32 reference.
    ref = x2d @ w + b
    ref = ref + r2d
    mu = ref.mean(-1, keepdims=True)
    var = ((ref - mu) ** 2).mean(-1, keepdims=True)
    ref = (ref - mu) / jnp.sqrt(var + eps) * gamma + beta

    # Default path: bf16 MXU operands, f32 accumulation / LayerNorm.
    out_bf16 = bert_output(x2d, r2d, w, b, gamma, beta, eps=eps)
    jax.block_until_ready(out_bf16)
    assert out_bf16.shape == (B * S, H)
    assert jnp.allclose(out_bf16, ref, atol=3e-2, rtol=3e-2), \
        "bf16-MXU path mismatch vs f32 reference"

    # Full-f32 path at tight tolerance.
    out_f32 = bert_output(x2d, r2d, w, b, gamma, beta, eps=eps, matmul_dtype=None)
    jax.block_until_ready(out_f32)
    assert jnp.allclose(out_f32, ref, atol=1e-4, rtol=1e-4), \
        "f32 path mismatch vs reference"

    print("KERNEL_OK")
</pallas_src>

<mosaic_0001>
module attributes {stable_mosaic.version = 11 : i64} {
  func.func @bert_output_kernel(%arg0: i32, %arg1: memref<16x512xf32, #tpu.memory_space<vmem>>, %arg2: memref<16x128xf32, #tpu.memory_space<vmem>>, %arg3: memref<512x128xbf16, #tpu.memory_space<vmem>>, %arg4: memref<1x128xf32, #tpu.memory_space<vmem>>, %arg5: memref<1x128xf32, #tpu.memory_space<vmem>>, %arg6: memref<1x128xf32, #tpu.memory_space<vmem>>, %arg7: memref<16x128xf32, #tpu.memory_space<vmem>>) attributes {dimension_semantics = [#tpu.dimension_semantics<parallel>], iteration_bounds = array<i64: 1>, scalar_prefetch = 0 : i64, scratch_operands = 0 : i64, tpu.core_type = #tpu.core_type<tc>, window_params = [{transform_indices = @transform_0, window_bounds = array<i64: 16, 512>}, {transform_indices = @transform_1, window_bounds = array<i64: 16, 128>}, {pipeline_mode = #tpu.pipeline_mode<synchronous>, transform_indices = @transform_2, window_bounds = array<i64: 512, 128>}, {pipeline_mode = #tpu.pipeline_mode<synchronous>, transform_indices = @transform_3, window_bounds = array<i64: 1, 128>}, {pipeline_mode = #tpu.pipeline_mode<synchronous>, transform_indices = @transform_4, window_bounds = array<i64: 1, 128>}, {pipeline_mode = #tpu.pipeline_mode<synchronous>, transform_indices = @transform_5, window_bounds = array<i64: 1, 128>}, {transform_indices = @transform_6, window_bounds = array<i64: 16, 128>}]} {
    %c0 = arith.constant 0 : index
    %c0_0 = arith.constant 0 : index
    %0 = vector.load %arg1[%c0, %c0_0] : memref<16x512xf32, #tpu.memory_space<vmem>>, vector<16x512xf32>
    %1 = arith.truncf %0 : vector<16x512xf32> to vector<16x512xbf16>
    %c0_1 = arith.constant 0 : index
    %c0_2 = arith.constant 0 : index
    %2 = vector.load %arg3[%c0_1, %c0_2] : memref<512x128xbf16, #tpu.memory_space<vmem>>, vector<512x128xbf16>
    %cst = arith.constant dense<0.000000e+00> : vector<16x128xf32>
    %3 = tpu.matmul %1, %2, %cst {dimension_numbers = #tpu.dot_dimension_numbers<[1], [0], [0], [1], [0, 0, 1, 1], [], []>} : vector<16x512xbf16>, vector<512x128xbf16>, vector<16x128xf32> -> vector<16x128xf32>
    %c0_3 = arith.constant 0 : index
    %c0_4 = arith.constant 0 : index
    %4 = vector.load %arg2[%c0_3, %c0_4] : memref<16x128xf32, #tpu.memory_space<vmem>>, vector<16x128xf32>
    %c0_5 = arith.constant 0 : index
    %c0_6 = arith.constant 0 : index
    %5 = vector.load %arg4[%c0_5, %c0_6] : memref<1x128xf32, #tpu.memory_space<vmem>>, vector<1x128xf32>
    %6 = vector.broadcast %5 : vector<1x128xf32> to vector<16x128xf32>
    %7 = arith.addf %4, %6 : vector<16x128xf32>
    %8 = arith.addf %3, %7 : vector<16x128xf32>
    %cst_7 = arith.constant dense<0.000000e+00> : vector<16xf32>
    %9 = vector.multi_reduction <add>, %8, %cst_7 [1] : vector<16x128xf32> to vector<16xf32>
    %10 = vector.shape_cast %9 : vector<16xf32> to vector<16x1xf32>
    %11 = arith.mulf %8, %8 : vector<16x128xf32>
    %cst_8 = arith.constant dense<0.000000e+00> : vector<16xf32>
    %12 = vector.multi_reduction <add>, %11, %cst_8 [1] : vector<16x128xf32> to vector<16xf32>
    %13 = vector.shape_cast %12 : vector<16xf32> to vector<16x1xf32>
    %cst_9 = arith.constant 7.812500e-03 : f32
    %14 = vector.broadcast %cst_9 : f32 to vector<16x1xf32>
    %15 = arith.mulf %10, %14 : vector<16x1xf32>
    %cst_10 = arith.constant 7.812500e-03 : f32
    %16 = vector.broadcast %cst_10 : f32 to vector<16x1xf32>
    %17 = arith.mulf %13, %16 : vector<16x1xf32>
    %18 = arith.mulf %15, %15 : vector<16x1xf32>
    %19 = arith.subf %17, %18 : vector<16x1xf32>
    %cst_11 = arith.constant 0.000000e+00 : f32
    %20 = vector.broadcast %cst_11 : f32 to vector<16x1xf32>
    %21 = arith.maximumf %19, %20 : vector<16x1xf32>
    %cst_12 = arith.constant 9.99999996E-13 : f32
    %22 = vector.broadcast %cst_12 : f32 to vector<16x1xf32>
    %23 = arith.addf %21, %22 : vector<16x1xf32>
    %24 = math.rsqrt %23 : vector<16x1xf32>
    %25 = vector.broadcast %15 : vector<16x1xf32> to vector<16x128xf32>
    %26 = arith.subf %8, %25 : vector<16x128xf32>
    %c0_13 = arith.constant 0 : index
    %c0_14 = arith.constant 0 : index
    %27 = vector.load %arg5[%c0_13, %c0_14] : memref<1x128xf32, #tpu.memory_space<vmem>>, vector<1x128xf32>
    %28 = vector.broadcast %24 : vector<16x1xf32> to vector<16x128xf32>
    %29 = vector.broadcast %27 : vector<1x128xf32> to vector<16x128xf32>
    %30 = arith.mulf %28, %29 : vector<16x128xf32>
    %31 = arith.mulf %26, %30 : vector<16x128xf32>
    %c0_15 = arith.constant 0 : index
    %c0_16 = arith.constant 0 : index
    %32 = vector.load %arg6[%c0_15, %c0_16] : memref<1x128xf32, #tpu.memory_space<vmem>>, vector<1x128xf32>
    %33 = vector.broadcast %32 : vector<1x128xf32> to vector<16x128xf32>
    %34 = arith.addf %31, %33 : vector<16x128xf32>
    %c0_17 = arith.constant 0 : index
    %c0_18 = arith.constant 0 : index
    %35 = vector.load %arg7[%c0_17, %c0_18] : memref<16x128xf32, #tpu.memory_space<vmem>>, vector<16x128xf32>
    tpu.vector_store %arg7[%c0_17, %c0_18], %34 {strides = array<i32>} : memref<16x128xf32, #tpu.memory_space<vmem>>, vector<16x128xf32>,
    return
  }
  func.func @transform_0(%arg0: i32) -> (i32, i32) {
    %c0_i32 = arith.constant 0 : i32
    %c0_i32_0 = arith.constant 0 : i32
    return %arg0, %c0_i32 : i32, i32
  }
  func.func @transform_1(%arg0: i32) -> (i32, i32) {
    %c0_i32 = arith.constant 0 : i32
    %c0_i32_0 = arith.constant 0 : i32
    return %arg0, %c0_i32 : i32, i32
  }
  func.func @transform_2(%arg0: i32) -> (i32, i32) {
    %c0_i32 = arith.constant 0 : i32
    %c0_i32_0 = arith.constant 0 : i32
    %c0_i32_1 = arith.constant 0 : i32
    return %c0_i32, %c0_i32_0 : i32, i32
  }
  func.func @transform_3(%arg0: i32) -> (i32, i32) {
    %c0_i32 = arith.constant 0 : i32
    %c0_i32_0 = arith.constant 0 : i32
    %c0_i32_1 = arith.constant 0 : i32
    return %c0_i32, %c0_i32_0 : i32, i32
  }
  func.func @transform_4(%arg0: i32) -> (i32, i32) {
    %c0_i32 = arith.constant 0 : i32
    %c0_i32_0 = arith.constant 0 : i32
    %c0_i32_1 = arith.constant 0 : i32
    return %c0_i32, %c0_i32_0 : i32, i32
  }
  func.func @transform_5(%arg0: i32) -> (i32, i32) {
    %c0_i32 = arith.constant 0 : i32
    %c0_i32_0 = arith.constant 0 : i32
    %c0_i32_1 = arith.constant 0 : i32
    return %c0_i32, %c0_i32_0 : i32, i32
  }
  func.func @transform_6(%arg0: i32) -> (i32, i32) {
    %c0_i32 = arith.constant 0 : i32
    %c0_i32_0 = arith.constant 0 : i32
    return %arg0, %c0_i32 : i32, i32
  }
}

module attributes {stable_mosaic.version = 11 : i64} {
  func.func @bert_output_kernel(%arg0: i32, %arg1: memref<16x512xf32, #tpu.memory_space<vmem>>, %arg2: memref<16x128xf32, #tpu.memory_space<vmem>>, %arg3: memref<512x128xbf16, #tpu.memory_space<vmem>>, %arg4: memref<1x128xf32, #tpu.memory_space<vmem>>, %arg5: memref<1x128xf32, #tpu.memory_space<vmem>>, %arg6: memref<1x128xf32, #tpu.memory_space<vmem>>, %arg7: memref<16x128xf32, #tpu.memory_space<vmem>>) attributes {dimension_semantics = [#tpu.dimension_semantics<parallel>], iteration_bounds = array<i64: 1>, scalar_prefetch = 0 : i64, scratch_operands = 0 : i64, tpu.core_type = #tpu.core_type<tc>, window_params = [{transform_indices = @transform_0, window_bounds = array<i64: 16, 512>}, {transform_indices = @transform_1, window_bounds = array<i64: 16, 128>}, {pipeline_mode = #tpu.pipeline_mode<synchronous>, transform_indices = @transform_2, window_bounds = array<i64: 512, 128>}, {pipeline_mode = #tpu.pipeline_mode<synchronous>, transform_indices = @transform_3, window_bounds = array<i64: 1, 128>}, {pipeline_mode = #tpu.pipeline_mode<synchronous>, transform_indices = @transform_4, window_bounds = array<i64: 1, 128>}, {pipeline_mode = #tpu.pipeline_mode<synchronous>, transform_indices = @transform_5, window_bounds = array<i64: 1, 128>}, {transform_indices = @transform_6, window_bounds = array<i64: 16, 128>}]} {
    %c0 = arith.constant 0 : index
    %c0_0 = arith.constant 0 : index
    %0 = vector.load %arg1[%c0, %c0_0] : memref<16x512xf32, #tpu.memory_space<vmem>>, vector<16x512xf32>
    %1 = arith.truncf %0 : vector<16x512xf32> to vector<16x512xbf16>
    %c0_1 = arith.constant 0 : index
    %c0_2 = arith.constant 0 : index
    %2 = vector.load %arg3[%c0_1, %c0_2] : memref<512x128xbf16, #tpu.memory_space<vmem>>, vector<512x128xbf16>
    %cst = arith.constant dense<0.000000e+00> : vector<16x128xf32>
    %3 = tpu.matmul %1, %2, %cst {dimension_numbers = #tpu.dot_dimension_numbers<[1], [0], [0], [1], [0, 0, 1, 1], [], []>} : vector<16x512xbf16>, vector<512x128xbf16>, vector<16x128xf32> -> vector<16x128xf32>
    %c0_3 = arith.constant 0 : index
    %c0_4 = arith.constant 0 : index
    %4 = vector.load %arg2[%c0_3, %c0_4] : memref<16x128xf32, #tpu.memory_space<vmem>>, vector<16x128xf32>
    %c0_5 = arith.constant 0 : index
    %c0_6 = arith.constant 0 : index
    %5 = vector.load %arg4[%c0_5, %c0_6] : memref<1x128xf32, #tpu.memory_space<vmem>>, vector<1x128xf32>
    %6 = vector.broadcast %5 : vector<1x128xf32> to vector<16x128xf32>
    %7 = arith.addf %4, %6 : vector<16x128xf32>
    %8 = arith.addf %3, %7 : vector<16x128xf32>
    %cst_7 = arith.constant dense<0.000000e+00> : vector<16xf32>
    %9 = vector.multi_reduction <add>, %8, %cst_7 [1] : vector<16x128xf32> to vector<16xf32>
    %10 = vector.shape_cast %9 : vector<16xf32> to vector<16x1xf32>
    %11 = arith.mulf %8, %8 : vector<16x128xf32>
    %cst_8 = arith.constant dense<0.000000e+00> : vector<16xf32>
    %12 = vector.multi_reduction <add>, %11, %cst_8 [1] : vector<16x128xf32> to vector<16xf32>
    %13 = vector.shape_cast %12 : vector<16xf32> to vector<16x1xf32>
    %cst_9 = arith.constant 7.812500e-03 : f32
    %14 = vector.broadcast %cst_9 : f32 to vector<16x1xf32>
    %15 = arith.mulf %10, %14 : vector<16x1xf32>
    %cst_10 = arith.constant 7.812500e-03 : f32
    %16 = vector.broadcast %cst_10 : f32 to vector<16x1xf32>
    %17 = arith.mulf %13, %16 : vector<16x1xf32>
    %18 = arith.mulf %15, %15 : vector<16x1xf32>
    %19 = arith.subf %17, %18 : vector<16x1xf32>
    %cst_11 = arith.constant 0.000000e+00 : f32
    %20 = vector.broadcast %cst_11 : f32 to vector<16x1xf32>
    %21 = arith.maximumf %19, %20 : vector<16x1xf32>
    %cst_12 = arith.constant 9.99999996E-13 : f32
    %22 = vector.broadcast %cst_12 : f32 to vector<16x1xf32>
    %23 = arith.addf %21, %22 : vector<16x1xf32>
    %24 = math.rsqrt %23 : vector<16x1xf32>
    %25 = vector.broadcast %15 : vector<16x1xf32> to vector<16x128xf32>
    %26 = arith.subf %8, %25 : vector<16x128xf32>
    %c0_13 = arith.constant 0 : index
    %c0_14 = arith.constant 0 : index
    %27 = vector.load %arg5[%c0_13, %c0_14] : memref<1x128xf32, #tpu.memory_space<vmem>>, vector<1x128xf32>
    %28 = vector.broadcast %24 : vector<16x1xf32> to vector<16x128xf32>
    %29 = vector.broadcast %27 : vector<1x128xf32> to vector<16x128xf32>
    %30 = arith.mulf %28, %29 : vector<16x128xf32>
    %31 = arith.mulf %26, %30 : vector<16x128xf32>
    %c0_15 = arith.constant 0 : index
    %c0_16 = arith.constant 0 : index
    %32 = vector.load %arg6[%c0_15, %c0_16] : memref<1x128xf32, #tpu.memory_space<vmem>>, vector<1x128xf32>
    %33 = vector.broadcast %32 : vector<1x128xf32> to vector<16x128xf32>
    %34 = arith.addf %31, %33 : vector<16x128xf32>
    %c0_17 = arith.constant 0 : index
    %c0_18 = arith.constant 0 : index
    %35 = vector.load %arg7[%c0_17, %c0_18] : memref<16x128xf32, #tpu.memory_space<vmem>>, vector<16x128xf32>
    tpu.vector_store %arg7[%c0_17, %c0_18], %34 {strides = array<i32>} : memref<16x128xf32, #tpu.memory_space<vmem>>, vector<16x128xf32>,
    return
  }
  func.func @transform_0(%arg0: i32) -> (i32, i32) {
    %c0_i32 = arith.constant 0 : i32
    %c0_i32_0 = arith.constant 0 : i32
    return %arg0, %c0_i32 : i32, i32
  }
  func.func @transform_1(%arg0: i32) -> (i32, i32) {
    %c0_i32 = arith.constant 0 : i32
    %c0_i32_0 = arith.constant 0 : i32
    return %arg0, %c0_i32 : i32, i32
  }
  func.func @transform_2(%arg0: i32) -> (i32, i32) {
    %c0_i32 = arith.constant 0 : i32
    %c0_i32_0 = arith.constant 0 : i32
    %c0_i32_1 = arith.constant 0 : i32
    return %c0_i32, %c0_i32_0 : i32, i32
  }
  func.func @transform_3(%arg0: i32) -> (i32, i32) {
    %c0_i32 = arith.constant 0 : i32
    %c0_i32_0 = arith.constant 0 : i32
    %c0_i32_1 = arith.constant 0 : i32
    return %c0_i32, %c0_i32_0 : i32, i32
  }
  func.func @transform_4(%arg0: i32) -> (i32, i32) {
    %c0_i32 = arith.constant 0 : i32
    %c0_i32_0 = arith.constant 0 : i32
    %c0_i32_1 = arith.constant 0 : i32
    return %c0_i32, %c0_i32_0 : i32, i32
  }
  func.func @transform_5(%arg0: i32) -> (i32, i32) {
    %c0_i32 = arith.constant 0 : i32
    %c0_i32_0 = arith.constant 0 : i32
    %c0_i32_1 = arith.constant 0 : i32
    return %c0_i32, %c0_i32_0 : i32, i32
  }
  func.func @transform_6(%arg0: i32) -> (i32, i32) {
    %c0_i32 = arith.constant 0 : i32
    %c0_i32_0 = arith.constant 0 : i32
    return %arg0, %c0_i32 : i32, i32
  }
}

</mosaic_0001>

<bundles_post_ra>
// kernel: tpu_custom_call.1
= control target key start
LH: loop header
LB: loop body
LE: loop exit
PB: predicated region body
PF: predicated region fallthrough
CT: control target
= control target key end

     0   :  { %11 = vsyncpa [#allocation3], 0  ;;  %s776_s0 = inlined_call_operand.hbm [shape: f32[16,512], index: 0, kind: input, shape index: {}]   ;;  %s777_s1 = inlined_call_operand.hbm [shape: f32[16,128], index: 1, kind: input, shape index: {}]   ;;  %s778_s2 = inlined_call_operand.hbm [shape: bf16[512,128], index: 2, kind: input, shape index: {}]   ;;  %s779_s3 = inlined_call_operand.vmem [shape: f32[1,128], index: 3, kind: input, shape index: {}]   ;;  %s780_s4 = inlined_call_operand.vmem [shape: f32[1,128], index: 4, kind: input, shape index: {}]   ;;  %s781_s5 = inlined_call_operand.vmem [shape: f32[1,128], index: 5, kind: input, shape index: {}]   ;;  %s782_s6 = inlined_call_operand.hbm [shape: f32[16,128], index: 6, kind: output, shape index: {}]  }
   0x1   :  { %12 = vsyncpa [#allocation6], 0 }
   0x2   :  { %13 = vsyncpa [#allocation4], 0  ;;  %s704_s21 = smov [#allocation5]  }
   0x3   :  { %s31_s22 = sshll.u32 %s704_s21, 4  ;;  %s32_s22 = int_to_ptr.vmem [resolvable:$true] %s31_s22 }
   0x4   :  { %s626_s23 = scalar_lea.vmem %s32_s22, 256  ;;  %p631_p1 = scmp.lt.s32.totalorder %s32_s22, %s32_s22 }
   0x5   :  { %p627_p0 = scmp.ne.s32.totalorder %s32_s22, %s626_s23  ;;  %p632_p2 = scmp.lt.s32.totalorder %s626_s23, %s626_s23 }
   0x7   :  { %p633_p3 = por %p632_p2, %p631_p1 }
   0x9   :  { %p634_p4 = pnand %p633_p3, %p627_p0 }
   0xb   :  { %637 = shalt.err (!%p634_p4)
}
   0xc   :  { %s705_s24 = smov 128   ;;  %s706_s25 = smov 8  }
   0xd   :  { %37 = dma.hbm_to_vmem [thread:$0]  %s777_s1, 256, %s32_s22, [#allocation6], %s705_s24, %s705_s24, %s706_s25  }
   0xe   :  { %s707_s28 = smov [#allocation2]  }
   0xf   :  { %s19_s29 = sshll.u32 %s707_s28, 4  ;;  %s20_s29 = int_to_ptr.vmem [resolvable:$true] %s19_s29 }
  0x10   :  { %s646_s30 = scalar_lea.vmem %s20_s29, 1024  ;;  %p651_p6 = scmp.lt.s32.totalorder %s20_s29, %s20_s29 }
  0x11   :  { %p647_p5 = scmp.ne.s32.totalorder %s20_s29, %s646_s30  ;;  %p652_p7 = scmp.lt.s32.totalorder %s646_s30, %s646_s30 }
  0x13   :  { %p653_p8 = por %p652_p7, %p651_p6 }
  0x15   :  { %p654_p9 = pnand %p653_p8, %p647_p5 }
  0x17   :  { %657 = shalt.err (!%p654_p9)
}
  0x18   :  { %s708_s7 = smov 512   ;;  %s709_s8 = smov 32  }
  0x19   :  { %25 = dma.hbm_to_vmem [thread:$0]  %s776_s0, 1024, %s20_s29, [#allocation3], %s708_s7, %s708_s7, %s709_s8  }
  0x1a   :  { %s710_s11 = smov [#allocation7]  }
  0x1b   :  { %s43_s12 = sshll.u32 %s710_s11, 4  ;;  %s44_s12 = int_to_ptr.vmem [resolvable:$true] %s43_s12 }
  0x1c   :  { %s666_s1 = scalar_lea.vmem %s44_s12, 4096  ;;  %p671_p11 = scmp.lt.s32.totalorder %s44_s12, %s44_s12 }
  0x1d   :  { %p667_p10 = scmp.ne.s32.totalorder %s44_s12, %s666_s1  ;;  %p672_p12 = scmp.lt.s32.totalorder %s666_s1, %s666_s1 }
  0x1f   :  { %p673_p13 = por %p672_p12, %p671_p11 }
  0x21   :  { %p674_p0 = pnand %p673_p13, %p667_p10 }
  0x23   :  { %677 = shalt.err (!%p674_p0)
}
  0x24   :  { %s711_s13 = smov 64   ;;  %s712_s14 = smov 4  }
  0x25   :  { %49 = dma.hbm_to_vmem [thread:$0]  %s778_s2, 4096, %s44_s12, [#allocation6], %s711_s13, %s711_s13, %s712_s14  }
  0x26   :  { %698 = dma.done.wait [#allocation3], 1024  }
  0x27   :  { %699 = vsyncadd [#allocation3], 4294966272 }
  0x28   :  { %700 = dma.done.wait [#allocation6], 4352  }
  0x29   :  { %701 = vsyncadd [#allocation6], 4294962944  ;;  %v582_v0 = vld [vmem:[#allocation7 + $0x78] sm:$0xff]   ;;  %v586_v4 = vld [vmem:[#allocation7 + $0x70] sm:$0xff]   ;;  %s713_s20 = smov [#allocation8]  }
  0x2a   :  { %v583_v1 = vld [vmem:[#allocation7 + $0xf8] sm:$0xff]   ;;  %528 = vmatprep.subr.bf16.mxu0 %v582_v0  ;;  %v587_v5 = vld [vmem:[#allocation7 + $0xf0] sm:$0xff]   ;;  %v590_v8 = vld [vmem:[#allocation7 + $0x68] sm:$0xff]   ;;  %s480_s21 = sshll.u32 %s713_s20, 4  ;;  %s481_s21 = int_to_ptr.vmem [resolvable:$true] %s480_s21 }
  0x2b   :  { %v584_v2 = vld [vmem:[#allocation7 + $0x38] sm:$0xff]   ;;  %550 = vmatprep.subr.bf16.mxu1 %v583_v1  ;;  %v588_v6 = vld [vmem:[#allocation7 + $0x30] sm:$0xff]   ;;  %v591_v9 = vld [vmem:[#allocation7 + $0xe8] sm:$0xff]   ;;  %p683_p2 = scmp.lt.s32.totalorder %s481_s21, %s481_s21 }
  0x2c   :  { %v585_v3 = vld [vmem:[#allocation7 + $0xb8] sm:$0xff]   ;;  %529 = vmatpush3.bf16.msra.mxu0 %v584_v2  ;;  %v589_v7 = vld [vmem:[#allocation7 + $0xb0] sm:$0xff]   ;;  %v592_v10 = vld [vmem:[#allocation7 + $0x28] sm:$0xff]  }
  0x2d   :  { %551 = vmatpush3.bf16.msra.mxu1 %v585_v3  ;;  %530 = vmatprep.subr.bf16.mxu0 %v586_v4  ;;  %v593_v11 = vld [vmem:[#allocation7 + $0xa8] sm:$0xff]   ;;  %v594_v12 = vld [vmem:[#allocation7 + $0x60] sm:$0xff]   ;;  %v598_v16 = vld [vmem:[#allocation7 + $0x58] sm:$0xff]  }
  0x2e   :  { %552 = vmatprep.subr.bf16.mxu1 %v587_v5  ;;  %v595_v13 = vld [vmem:[#allocation7 + $0xe0] sm:$0xff]   ;;  %v599_v17 = vld [vmem:[#allocation7 + $0xd8] sm:$0xff]   ;;  %v602_v20 = vld [vmem:[#allocation7 + $0x50] sm:$0xff]  }
  0x2f   :  { %v596_v14 = vld [vmem:[#allocation7 + $0x20] sm:$0xff]   ;;  %v600_v18 = vld [vmem:[#allocation7 + $0x18] sm:$0xff]   ;;  %v603_v21 = vld [vmem:[#allocation7 + $0xd0] sm:$0xff]  }
  0x30   :  { %531 = vmatpush3.bf16.msra.mxu0 %v588_v6  ;;  %v597_v15 = vld [vmem:[#allocation7 + $0xa0] sm:$0xff]   ;;  %v601_v19 = vld [vmem:[#allocation7 + $0x98] sm:$0xff]   ;;  %v604_v22 = vld [vmem:[#allocation7 + $0x10] sm:$0xff]  }
  0x31   :  { %553 = vmatpush3.bf16.msra.mxu1 %v589_v7  ;;  %532 = vmatprep.subr.bf16.mxu0 %v590_v8  ;;  %v605_v23 = vld [vmem:[#allocation7 + $0x90] sm:$0xff]   ;;  %v606_v24 = vld [vmem:[#allocation7 + $0x48] sm:$0xff]   ;;  %v610_v28 = vld [vmem:[#allocation7 + $0x40] sm:$0xff]  }
  0x32   :  { %554 = vmatprep.subr.bf16.mxu1 %v591_v9  ;;  %v607_v25 = vld [vmem:[#allocation7 + $0xc8] sm:$0xff]   ;;  %v611_v29 = vld [vmem:[#allocation7 + $0xc0] sm:$0xff]   ;;  %v67_v32 = vld [vmem:[#allocation2 + $0x8] sm:$0xff] }
  0x33   :  { %v608_v26 = vld [vmem:[#allocation7 + $0x8] sm:$0xff]   ;;  %v612_v30 = vld [vmem:[#allocation7] sm:$0xff]   ;;  %v71_v33 = vld [vmem:[#allocation2 + $0x28] sm:$0xff] }
  0x34   :  { %533 = vmatpush3.bf16.msra.mxu0 %v592_v10  ;;  %v609_v27 = vld [vmem:[#allocation7 + $0x88] sm:$0xff]   ;;  %v613_v31 = vld [vmem:[#allocation7 + $0x80] sm:$0xff]   ;;  %v75_v35 = vpack.c.bf16 %v71_v33, %v67_v32  ;;  %v66_v37 = vld [vmem:[#allocation2] sm:$0xff] }
  0x35   :  { %555 = vmatpush3.bf16.msra.mxu1 %v593_v11  ;;  %534 = vmatprep.subr.bf16.mxu0 %v594_v12  ;;  %v69_v34 = vld [vmem:[#allocation2 + $0x18] sm:$0xff]  ;;  %v70_v38 = vld [vmem:[#allocation2 + $0x20] sm:$0xff]  ;;  %v68_v41 = vld [vmem:[#allocation2 + $0x10] sm:$0xff] }
  0x36   :  { %556 = vmatprep.subr.bf16.mxu1 %v595_v13  ;;  %v73_v36 = vld [vmem:[#allocation2 + $0x38] sm:$0xff]  ;;  %v74_v40 = vpack.c.bf16 %v70_v38, %v66_v37  ;;  %v72_v42 = vld [vmem:[#allocation2 + $0x30] sm:$0xff]  ;;  %377 = vmatprep.mubr.bf16.mxu0 %v75_v35  ;;  %v142_v44 = vld [vmem:[#allocation5] sm:$0xff] }
  0x37   :  { %v77_v39 = vpack.c.bf16 %v73_v36, %v69_v34  ;;  %v76_v43 = vpack.c.bf16 %v72_v42, %v68_v41  ;;  %v493_v45 = vld [vmem:[%s779_s3] ss:$0 sm:$0xff]  ;;  %v143_v50 = vld [vmem:[#allocation5 + $0x8] sm:$0xff] }
  0x38   :  { %535 = vmatpush3.bf16.msra.mxu0 %v596_v14  ;;  %v151_v48 = vadd.f32 %v493_v45, %v142_v44  ;;  %v152_v57 = vadd.f32 %v493_v45, %v143_v50 }
  0x39   :  { %557 = vmatpush3.bf16.msra.mxu1 %v597_v15  ;;  %536 = vmatprep.subr.bf16.mxu0 %v598_v16 }
  0x3a   :  { %558 = vmatprep.subr.bf16.mxu1 %v599_v17  ;;  %418 = vmatprep.mubr.bf16.mxu1 %v77_v39 }
  0x3c   :  { %537 = vmatpush3.bf16.msra.mxu0 %v600_v18 }
  0x3d   :  { %559 = vmatpush3.bf16.msra.mxu1 %v601_v19  ;;  %538 = vmatprep.subr.bf16.mxu0 %v602_v20  ;;  %v526_v19 = vld [vmem:[%s780_s4] ss:$0 sm:$0xff]  ;;  %s678_s4 = scalar_lea.vmem %s481_s21, 256 }
  0x3e   :  { %560 = vmatprep.subr.bf16.mxu1 %v603_v21  ;;  %p679_p1 = scmp.ne.s32.totalorder %s481_s21, %s678_s4  ;;  %p684_p3 = scmp.lt.s32.totalorder %s678_s4, %s678_s4 }
  0x40   :  { %539 = vmatpush3.bf16.msra.mxu0 %v604_v22  ;;  %p685_p4 = por %p684_p3, %p683_p2 }
  0x41   :  { %561 = vmatpush3.bf16.msra.mxu1 %v605_v23  ;;  %540 = vmatprep.subr.bf16.mxu0 %v606_v24  ;;  %v527_v23 = vld [vmem:[%s781_s5] ss:$0 sm:$0xff] }
  0x42   :  { %562 = vmatprep.subr.bf16.mxu1 %v607_v25  ;;  %p686_p5 = pnand %p685_p4, %p679_p1 }
  0x44   :  { %541 = vmatpush3.bf16.msra.mxu0 %v608_v26 }
  0x45   :  { %563 = vmatpush3.bf16.msra.mxu1 %v609_v27  ;;  %542 = vmatprep.subr.bf16.mxu0 %v610_v28 }
  0x46   :  { %564 = vmatprep.subr.bf16.mxu1 %v611_v29 }
  0x48   :  { %543 = vmatpush3.bf16.msra.mxu0 %v612_v30 }
  0x49   :  { %565 = vmatpush3.bf16.msra.mxu1 %v613_v31 }
  0x4b   :  { %378 = vmatmul.mubr.bf16.vlgmr.msra.gmra.mxu0 %v74_v40 }
  0x4c   :  { %419 = vmatmul.mubr.bf16.vlgmr.msra.gmra.mxu1 %v76_v43 }
 0x10b   :  { %v544_v46 = vpop.f32.mrf.mxu0 }
 0x10c   :  { %v566_v47 = vpop.f32.mrf.mxu1 }
 0x10d   :  { %v545_v49 = vpop.f32.mrf.mxu0 }
 0x10e   :  { %v546_v51 = vadd.f32 %v545_v49, %v544_v46  ;;  %v567_v52 = vpop.f32.mrf.mxu1 }
 0x10f   :  { %v547_v53 = vpop.f32.mrf.mxu0  ;;  %v568_v55 = vadd.f32 %v567_v52, %v566_v47 }
 0x110   :  { %v380_v54 = vadd.f32 %v546_v51, %v151_v48  ;;  %v569_v56 = vpop.f32.mrf.mxu1 }
 0x111   :  { %v548_v58 = vpop.f32.mrf.mxu0 }
 0x112   :  { %v421_v59 = vadd.f32 %v568_v55, %v380_v54  ;;  %v549_v60 = vadd.f32 %v548_v58, %v547_v53  ;;  %v570_v61 = vpop.f32.mrf.mxu1 }
 0x113   :  { %v571_v63 = vadd.f32 %v570_v61, %v569_v56 }
 0x114   :  { %v383_v62 = vadd.f32 %v549_v60, %v152_v57  ;;  %427 = vadd.xlane.f32.xlu0 %v421_v59  ;;  %v431_v0 = vmul.f32 %v421_v59, %v421_v59 }
 0x116   :  { %v424_v1 = vadd.f32 %v571_v63, %v383_v62  ;;  %433 = vadd.xlane.f32.xlu1 %v431_v0 }
 0x118   :  { %429 = vadd.xlane.f32.xlu0 %v424_v1  ;;  %v432_v2 = vmul.f32 %v424_v1, %v424_v1 }
 0x11a   :  { %435 = vadd.xlane.f32.xlu1 %v432_v2 }
 0x19d   :  { %v428_v3 = vpop.xlane.xlu0 %427 }
 0x19e   :  { %v437_v4 = vmul.f32 0.0078125, %v428_v3 }
 0x19f   :  { %v434_v5 = vpop.xlane.xlu1 %433 }
 0x1a0   :  { %v441_v6 = vmul.f32 %v437_v4, %v437_v4  ;;  %v439_v7 = vmul.f32 0.0078125, %v434_v5  ;;  %v451_v21 = vsub.f32 %v421_v59, %v437_v4 }
 0x1a1   :  { %v430_v8 = vpop.xlane.xlu0 %429 }
 0x1a2   :  { %v443_v9 = vsub.f32 %v439_v7, %v441_v6  ;;  %v438_v10 = vmul.f32 0.0078125, %v430_v8 }
 0x1a3   :  { %v436_v11 = vpop.xlane.xlu1 %435 }
 0x1a4   :  { %v445_v12 = vmax.f32 %v443_v9, 0.0  ;;  %v442_v13 = vmul.f32 %v438_v10, %v438_v10  ;;  %v440_v14 = vmul.f32 0.0078125, %v436_v11  ;;  %v452_v26 = vsub.f32 %v424_v1, %v438_v10 }
 0x1a6   :  { %v447_v15 = vadd.f32 1e-12, %v445_v12  ;;  %v444_v16 = vsub.f32 %v440_v14, %v442_v13 }
 0x1a8   :  { %614 = vrsqrt.f32 %v447_v15  ;;  %v446_v17 = vmax.f32 %v444_v16, 0.0 }
 0x1aa   :  { %v448_v18 = vadd.f32 1e-12, %v446_v17 }
 0x1ac   :  { %616 = vrsqrt.f32 %v448_v18 }
 0x1b5   :  { %v615_v20 = vpop.eup %614 }
 0x1b6   :  { %v460_v22 = vmul.f32 %v615_v20, %v526_v19 }
 0x1b8   :  { %v462_v24 = vmul.f32 %v460_v22, %v451_v21 }
 0x1b9   :  { %v617_v25 = vpop.eup %616 }
 0x1ba   :  { %v461_v27 = vmul.f32 %v617_v25, %v526_v19  ;;  %v471_v28 = vadd.f32 %v527_v23, %v462_v24 }
 0x1bc   :  { %v463_v29 = vmul.f32 %v461_v27, %v452_v26  ;;  %473 = vst [vmem:[#allocation8] sm:$0xff] %v471_v28 }
 0x1be   :  { %v472_v30 = vadd.f32 %v527_v23, %v463_v29 }
 0x1c0   :  { %474 = vst [vmem:[#allocation8 + $0x8] sm:$0xff] %v472_v30 }
 0x1c1   :  { %689 = shalt.err (!%p686_p5)
}
 0x1c2   :  { %486 = dma.vmem_to_hbm [thread:$0]  %s481_s21, 256, %s782_s6, [#allocation4], %s705_s24, %s705_s24, %s706_s25  }
 0x1c3   :  { %702 = dma.done.wait [#allocation4], 256  }
 0x1c4   :  { %703 = vsyncadd [#allocation4], 4294967040 }
 0x1c5   :  { %490 = vsyncpa [#allocation3], 1 }
 0x1c6   :  { %491 = vsyncpa [#allocation6], 1 }
 0x1c7   :  { %492 = vsyncpa [#allocation4], 1 }

// kernel: tpu_custom_call.1
= control target key start
LH: loop header
LB: loop body
LE: loop exit
PB: predicated region body
PF: predicated region fallthrough
CT: control target
= control target key end

     0   :  { %11 = vsyncpa [#allocation3], 0  ;;  %s776_s0 = inlined_call_operand.hbm [shape: f32[16,512], index: 0, kind: input, shape index: {}]   ;;  %s777_s1 = inlined_call_operand.hbm [shape: f32[16,128], index: 1, kind: input, shape index: {}]   ;;  %s778_s2 = inlined_call_operand.hbm [shape: bf16[512,128], index: 2, kind: input, shape index: {}]   ;;  %s779_s3 = inlined_call_operand.vmem [shape: f32[1,128], index: 3, kind: input, shape index: {}]   ;;  %s780_s4 = inlined_call_operand.vmem [shape: f32[1,128], index: 4, kind: input, shape index: {}]   ;;  %s781_s5 = inlined_call_operand.vmem [shape: f32[1,128], index: 5, kind: input, shape index: {}]   ;;  %s782_s6 = inlined_call_operand.hbm [shape: f32[16,128], index: 6, kind: output, shape index: {}]  }
   0x1   :  { %12 = vsyncpa [#allocation6], 0 }
   0x2   :  { %13 = vsyncpa [#allocation4], 0  ;;  %s704_s21 = smov [#allocation5]  }
   0x3   :  { %s31_s22 = sshll.u32 %s704_s21, 4  ;;  %s32_s22 = int_to_ptr.vmem [resolvable:$true] %s31_s22 }
   0x4   :  { %s626_s23 = scalar_lea.vmem %s32_s22, 256  ;;  %p631_p1 = scmp.lt.s32.totalorder %s32_s22, %s32_s22 }
   0x5   :  { %p627_p0 = scmp.ne.s32.totalorder %s32_s22, %s626_s23  ;;  %p632_p2 = scmp.lt.s32.totalorder %s626_s23, %s626_s23 }
   0x7   :  { %p633_p3 = por %p632_p2, %p631_p1 }
   0x9   :  { %p634_p4 = pnand %p633_p3, %p627_p0 }
   0xb   :  { %637 = shalt.err (!%p634_p4)
}
   0xc   :  { %s705_s24 = smov 128   ;;  %s706_s25 = smov 8  }
   0xd   :  { %37 = dma.hbm_to_vmem [thread:$0]  %s777_s1, 256, %s32_s22, [#allocation6], %s705_s24, %s705_s24, %s706_s25  }
   0xe   :  { %s707_s28 = smov [#allocation2]  }
   0xf   :  { %s19_s29 = sshll.u32 %s707_s28, 4  ;;  %s20_s29 = int_to_ptr.vmem [resolvable:$true] %s19_s29 }
  0x10   :  { %s646_s30 = scalar_lea.vmem %s20_s29, 1024  ;;  %p651_p6 = scmp.lt.s32.totalorder %s20_s29, %s20_s29 }
  0x11   :  { %p647_p5 = scmp.ne.s32.totalorder %s20_s29, %s646_s30  ;;  %p652_p7 = scmp.lt.s32.totalorder %s646_s30, %s646_s30 }
  0x13   :  { %p653_p8 = por %p652_p7, %p651_p6 }
  0x15   :  { %p654_p9 = pnand %p653_p8, %p647_p5 }
  0x17   :  { %657 = shalt.err (!%p654_p9)
}
  0x18   :  { %s708_s7 = smov 512   ;;  %s709_s8 = smov 32  }
  0x19   :  { %25 = dma.hbm_to_vmem [thread:$0]  %s776_s0, 1024, %s20_s29, [#allocation3], %s708_s7, %s708_s7, %s709_s8  }
  0x1a   :  { %s710_s11 = smov [#allocation7]  }
  0x1b   :  { %s43_s12 = sshll.u32 %s710_s11, 4  ;;  %s44_s12 = int_to_ptr.vmem [resolvable:$true] %s43_s12 }
  0x1c   :  { %s666_s1 = scalar_lea.vmem %s44_s12, 4096  ;;  %p671_p11 = scmp.lt.s32.totalorder %s44_s12, %s44_s12 }
  0x1d   :  { %p667_p10 = scmp.ne.s32.totalorder %s44_s12, %s666_s1  ;;  %p672_p12 = scmp.lt.s32.totalorder %s666_s1, %s666_s1 }
  0x1f   :  { %p673_p13 = por %p672_p12, %p671_p11 }
  0x21   :  { %p674_p0 = pnand %p673_p13, %p667_p10 }
  0x23   :  { %677 = shalt.err (!%p674_p0)
}
  0x24   :  { %s711_s13 = smov 64   ;;  %s712_s14 = smov 4  }
  0x25   :  { %49 = dma.hbm_to_vmem [thread:$0]  %s778_s2, 4096, %s44_s12, [#allocation6], %s711_s13, %s711_s13, %s712_s14  }
  0x26   :  { %698 = dma.done.wait [#allocation3], 1024  }
  0x27   :  { %699 = vsyncadd [#allocation3], 4294966272 }
  0x28   :  { %700 = dma.done.wait [#allocation6], 4352  }
  0x29   :  { %701 = vsyncadd [#allocation6], 4294962944  ;;  %v582_v0 = vld [vmem:[#allocation7 + $0x78] sm:$0xff]   ;;  %v586_v4 = vld [vmem:[#allocation7 + $0x70] sm:$0xff]   ;;  %s713_s20 = smov [#allocation8]  }
  0x2a   :  { %v583_v1 = vld [vmem:[#allocation7 + $0xf8] sm:$0xff]   ;;  %528 = vmatprep.subr.bf16.mxu0 %v582_v0  ;;  %v587_v5 = vld [vmem:[#allocation7 + $0xf0] sm:$0xff]   ;;  %v590_v8 = vld [vmem:[#allocation7 + $0x68] sm:$0xff]   ;;  %s480_s21 = sshll.u32 %s713_s20, 4  ;;  %s481_s21 = int_to_ptr.vmem [resolvable:$true] %s480_s21 }
  0x2b   :  { %v584_v2 = vld [vmem:[#allocation7 + $0x38] sm:$0xff]   ;;  %550 = vmatprep.subr.bf16.mxu1 %v583_v1  ;;  %v588_v6 = vld [vmem:[#allocation7 + $0x30] sm:$0xff]   ;;  %v591_v9 = vld [vmem:[#allocation7 + $0xe8] sm:$0xff]   ;;  %p683_p2 = scmp.lt.s32.totalorder %s481_s21, %s481_s21 }
  0x2c   :  { %v585_v3 = vld [vmem:[#allocation7 + $0xb8] sm:$0xff]   ;;  %529 = vmatpush3.bf16.msra.mxu0 %v584_v2  ;;  %v589_v7 = vld [vmem:[#allocation7 + $0xb0] sm:$0xff]   ;;  %v592_v10 = vld [vmem:[#allocation7 + $0x28] sm:$0xff]  }
  0x2d   :  { %551 = vmatpush3.bf16.msra.mxu1 %v585_v3  ;;  %530 = vmatprep.subr.bf16.mxu0 %v586_v4  ;;  %v593_v11 = vld [vmem:[#allocation7 + $0xa8] sm:$0xff]   ;;  %v594_v12 = vld [vmem:[#allocation7 + $0x60] sm:$0xff]   ;;  %v598_v16 = vld [vmem:[#allocation7 + $0x58] sm:$0xff]  }
  0x2e   :  { %552 = vmatprep.subr.bf16.mxu1 %v587_v5  ;;  %v595_v13 = vld [vmem:[#allocation7 + $0xe0] sm:$0xff]   ;;  %v599_v17 = vld [vmem:[#allocation7 + $0xd8] sm:$0xff]   ;;  %v602_v20 = vld [vmem:[#allocation7 + $0x50] sm:$0xff]  }
  0x2f   :  { %v596_v14 = vld [vmem:[#allocation7 + $0x20] sm:$0xff]   ;;  %v600_v18 = vld [vmem:[#allocation7 + $0x18] sm:$0xff]   ;;  %v603_v21 = vld [vmem:[#allocation7 + $0xd0] sm:$0xff]  }
  0x30   :  { %531 = vmatpush3.bf16.msra.mxu0 %v588_v6  ;;  %v597_v15 = vld [vmem:[#allocation7 + $0xa0] sm:$0xff]   ;;  %v601_v19 = vld [vmem:[#allocation7 + $0x98] sm:$0xff]   ;;  %v604_v22 = vld [vmem:[#allocation7 + $0x10] sm:$0xff]  }
  0x31   :  { %553 = vmatpush3.bf16.msra.mxu1 %v589_v7  ;;  %532 = vmatprep.subr.bf16.mxu0 %v590_v8  ;;  %v605_v23 = vld [vmem:[#allocation7 + $0x90] sm:$0xff]   ;;  %v606_v24 = vld [vmem:[#allocation7 + $0x48] sm:$0xff]   ;;  %v610_v28 = vld [vmem:[#allocation7 + $0x40] sm:$0xff]  }
  0x32   :  { %554 = vmatprep.subr.bf16.mxu1 %v591_v9  ;;  %v607_v25 = vld [vmem:[#allocation7 + $0xc8] sm:$0xff]   ;;  %v611_v29 = vld [vmem:[#allocation7 + $0xc0] sm:$0xff]   ;;  %v67_v32 = vld [vmem:[#allocation2 + $0x8] sm:$0xff] }
  0x33   :  { %v608_v26 = vld [vmem:[#allocation7 + $0x8] sm:$0xff]   ;;  %v612_v30 = vld [vmem:[#allocation7] sm:$0xff]   ;;  %v71_v33 = vld [vmem:[#allocation2 + $0x28] sm:$0xff] }
  0x34   :  { %533 = vmatpush3.bf16.msra.mxu0 %v592_v10  ;;  %v609_v27 = vld [vmem:[#allocation7 + $0x88] sm:$0xff]   ;;  %v613_v31 = vld [vmem:[#allocation7 + $0x80] sm:$0xff]   ;;  %v75_v35 = vpack.c.bf16 %v71_v33, %v67_v32  ;;  %v66_v37 = vld [vmem:[#allocation2] sm:$0xff] }
  0x35   :  { %555 = vmatpush3.bf16.msra.mxu1 %v593_v11  ;;  %534 = vmatprep.subr.bf16.mxu0 %v594_v12  ;;  %v69_v34 = vld [vmem:[#allocation2 + $0x18] sm:$0xff]  ;;  %v70_v38 = vld [vmem:[#allocation2 + $0x20] sm:$0xff]  ;;  %v68_v41 = vld [vmem:[#allocation2 + $0x10] sm:$0xff] }
  0x36   :  { %556 = vmatprep.subr.bf16.mxu1 %v595_v13  ;;  %v73_v36 = vld [vmem:[#allocation2 + $0x38] sm:$0xff]  ;;  %v74_v40 = vpack.c.bf16 %v70_v38, %v66_v37  ;;  %v72_v42 = vld [vmem:[#allocation2 + $0x30] sm:$0xff]  ;;  %377 = vmatprep.mubr.bf16.mxu0 %v75_v35  ;;  %v142_v44 = vld [vmem:[#allocation5] sm:$0xff] }
  0x37   :  { %v77_v39 = vpack.c.bf16 %v73_v36, %v69_v34  ;;  %v76_v43 = vpack.c.bf16 %v72_v42, %v68_v41  ;;  %v493_v45 = vld [vmem:[%s779_s3] ss:$0 sm:$0xff]  ;;  %v143_v50 = vld [vmem:[#allocation5 + $0x8] sm:$0xff] }
  0x38   :  { %535 = vmatpush3.bf16.msra.mxu0 %v596_v14  ;;  %v151_v48 = vadd.f32 %v493_v45, %v142_v44  ;;  %v152_v57 = vadd.f32 %v493_v45, %v143_v50 }
  0x39   :  { %557 = vmatpush3.bf16.msra.mxu1 %v597_v15  ;;  %536 = vmatprep.subr.bf16.mxu0 %v598_v16 }
  0x3a   :  { %558 = vmatprep.subr.bf16.mxu1 %v599_v17  ;;  %418 = vmatprep.mubr.bf16.mxu1 %v77_v39 }
  0x3c   :  { %537 = vmatpush3.bf16.msra.mxu0 %v600_v18 }
  0x3d   :  { %559 = vmatpush3.bf16.msra.mxu1 %v601_v19  ;;  %538 = vmatprep.subr.bf16.mxu0 %v602_v20  ;;  %v526_v19 = vld [vmem:[%s780_s4] ss:$0 sm:$0xff]  ;;  %s678_s4 = scalar_lea.vmem %s481_s21, 256 }
  0x3e   :  { %560 = vmatprep.subr.bf16.mxu1 %v603_v21  ;;  %p679_p1 = scmp.ne.s32.totalorder %s481_s21, %s678_s4  ;;  %p684_p3 = scmp.lt.s32.totalorder %s678_s4, %s678_s4 }
  0x40   :  { %539 = vmatpush3.bf16.msra.mxu0 %v604_v22  ;;  %p685_p4 = por %p684_p3, %p683_p2 }
  0x41   :  { %561 = vmatpush3.bf16.msra.mxu1 %v605_v23  ;;  %540 = vmatprep.subr.bf16.mxu0 %v606_v24  ;;  %v527_v23 = vld [vmem:[%s781_s5] ss:$0 sm:$0xff] }
  0x42   :  { %562 = vmatprep.subr.bf16.mxu1 %v607_v25  ;;  %p686_p5 = pnand %p685_p4, %p679_p1 }
  0x44   :  { %541 = vmatpush3.bf16.msra.mxu0 %v608_v26 }
  0x45   :  { %563 = vmatpush3.bf16.msra.mxu1 %v609_v27  ;;  %542 = vmatprep.subr.bf16.mxu0 %v610_v28 }
  0x46   :  { %564 = vmatprep.subr.bf16.mxu1 %v611_v29 }
  0x48   :  { %543 = vmatpush3.bf16.msra.mxu0 %v612_v30 }
  0x49   :  { %565 = vmatpush3.bf16.msra.mxu1 %v613_v31 }
  0x4b   :  { %378 = vmatmul.mubr.bf16.vlgmr.msra.gmra.mxu0 %v74_v40 }
  0x4c   :  { %419 = vmatmul.mubr.bf16.vlgmr.msra.gmra.mxu1 %v76_v43 }
 0x10b   :  { %v544_v46 = vpop.f32.mrf.mxu0 }
 0x10c   :  { %v566_v47 = vpop.f32.mrf.mxu1 }
 0x10d   :  { %v545_v49 = vpop.f32.mrf.mxu0 }
 0x10e   :  { %v546_v51 = vadd.f32 %v545_v49, %v544_v46  ;;  %v567_v52 = vpop.f32.mrf.mxu1 }
 0x10f   :  { %v547_v53 = vpop.f32.mrf.mxu0  ;;  %v568_v55 = vadd.f32 %v567_v52, %v566_v47 }
 0x110   :  { %v380_v54 = vadd.f32 %v546_v51, %v151_v48  ;;  %v569_v56 = vpop.f32.mrf.mxu1 }
 0x111   :  { %v548_v58 = vpop.f32.mrf.mxu0 }
 0x112   :  { %v421_v59 = vadd.f32 %v568_v55, %v380_v54  ;;  %v549_v60 = vadd.f32 %v548_v58, %v547_v53  ;;  %v570_v61 = vpop.f32.mrf.mxu1 }
 0x113   :  { %v571_v63 = vadd.f32 %v570_v61, %v569_v56 }
 0x114   :  { %v383_v62 = vadd.f32 %v549_v60, %v152_v57  ;;  %427 = vadd.xlane.f32.xlu0 %v421_v59  ;;  %v431_v0 = vmul.f32 %v421_v59, %v421_v59 }
 0x116   :  { %v424_v1 = vadd.f32 %v571_v63, %v383_v62  ;;  %433 = vadd.xlane.f32.xlu1 %v431_v0 }
 0x118   :  { %429 = vadd.xlane.f32.xlu0 %v424_v1  ;;  %v432_v2 = vmul.f32 %v424_v1, %v424_v1 }
 0x11a   :  { %435 = vadd.xlane.f32.xlu1 %v432_v2 }
 0x19d   :  { %v428_v3 = vpop.xlane.xlu0 %427 }
 0x19e   :  { %v437_v4 = vmul.f32 0.0078125, %v428_v3 }
 0x19f   :  { %v434_v5 = vpop.xlane.xlu1 %433 }
 0x1a0   :  { %v441_v6 = vmul.f32 %v437_v4, %v437_v4  ;;  %v439_v7 = vmul.f32 0.0078125, %v434_v5  ;;  %v451_v21 = vsub.f32 %v421_v59, %v437_v4 }
 0x1a1   :  { %v430_v8 = vpop.xlane.xlu0 %429 }
 0x1a2   :  { %v443_v9 = vsub.f32 %v439_v7, %v441_v6  ;;  %v438_v10 = vmul.f32 0.0078125, %v430_v8 }
 0x1a3   :  { %v436_v11 = vpop.xlane.xlu1 %435 }
 0x1a4   :  { %v445_v12 = vmax.f32 %v443_v9, 0.0  ;;  %v442_v13 = vmul.f32 %v438_v10, %v438_v10  ;;  %v440_v14 = vmul.f32 0.0078125, %v436_v11  ;;  %v452_v26 = vsub.f32 %v424_v1, %v438_v10 }
 0x1a6   :  { %v447_v15 = vadd.f32 1e-12, %v445_v12  ;;  %v444_v16 = vsub.f32 %v440_v14, %v442_v13 }
 0x1a8   :  { %614 = vrsqrt.f32 %v447_v15  ;;  %v446_v17 = vmax.f32 %v444_v16, 0.0 }
 0x1aa   :  { %v448_v18 = vadd.f32 1e-12, %v446_v17 }
 0x1ac   :  { %616 = vrsqrt.f32 %v448_v18 }
 0x1b5   :  { %v615_v20 = vpop.eup %614 }
 0x1b6   :  { %v460_v22 = vmul.f32 %v615_v20, %v526_v19 }
 0x1b8   :  { %v462_v24 = vmul.f32 %v460_v22, %v451_v21 }
 0x1b9   :  { %v617_v25 = vpop.eup %616 }
 0x1ba   :  { %v461_v27 = vmul.f32 %v617_v25, %v526_v19  ;;  %v471_v28 = vadd.f32 %v527_v23, %v462_v24 }
 0x1bc   :  { %v463_v29 = vmul.f32 %v461_v27, %v452_v26  ;;  %473 = vst [vmem:[#allocation8] sm:$0xff] %v471_v28 }
 0x1be   :  { %v472_v30 = vadd.f32 %v527_v23, %v463_v29 }
 0x1c0   :  { %474 = vst [vmem:[#allocation8 + $0x8] sm:$0xff] %v472_v30 }
 0x1c1   :  { %689 = shalt.err (!%p686_p5)
}
 0x1c2   :  { %486 = dma.vmem_to_hbm [thread:$0]  %s481_s21, 256, %s782_s6, [#allocation4], %s705_s24, %s705_s24, %s706_s25  }
 0x1c3   :  { %702 = dma.done.wait [#allocation4], 256  }
 0x1c4   :  { %703 = vsyncadd [#allocation4], 4294967040 }
 0x1c5   :  { %490 = vsyncpa [#allocation3], 1 }
 0x1c6   :  { %491 = vsyncpa [#allocation6], 1 }
 0x1c7   :  { %492 = vsyncpa [#allocation4], 1 }

</bundles_post_ra>
